<compile_context>
chip_gen: v7x
topology: tpu7x:2x2x1
jax: 0.10.0
libtpu: 0.0.40
codegen_flags: <defaults>
</compile_context>

<pallas_src>
import jax
import jax.numpy as jnp
from jax.experimental import pallas as pl
from jax.experimental.pallas import tpu as pltpu

BN_EPS = 1e-5
LEAKY_SLOPE = 0.2
LANE = 128
SUBLANE = 8


def _round_up(x: int, m: int) -> int:
    return ((x + m - 1) // m) * m


def _make_kernel(num_layers: int, num_graphs: int, g_pad: int, n_nodes: int):
    """Fused MLP (Linear -> LeakyReLU -> BN) x L  +  global max pool kernel."""

    def kernel(*refs):
        # refs layout:
        #   [0] bid   : (N, 1) int32   per-node graph id
        #   [1] xin   : (N, C0p)       concat(x, pos), zero-padded channels
        #   [2 + 4*l ...] per layer l: W (C_lp, C_{l+1}p), b, gamma, beta each (1, C_{l+1}p)
        #   [-1] out  : (G_pad, C_lastp)
        bid_ref = refs[0]
        xin_ref = refs[1]
        layer_refs = refs[2:2 + 4 * num_layers]
        out_ref = refs[2 + 4 * num_layers]

        h = xin_ref[...]                       # (N, C0p), f32
        inv_n = jnp.float32(1.0 / n_nodes)

        for l in range(num_layers):
            w_ref, b_ref, g_ref, bt_ref = layer_refs[4 * l:4 * l + 4]
            # Linear (optionally bf16 on the MXU; accumulate in f32).
            lhs = h if w_ref.dtype == jnp.float32 else h.astype(w_ref.dtype)
            h = jnp.dot(lhs, w_ref[...], preferred_element_type=jnp.float32) + b_ref[...]
            # LeakyReLU(0.2): mul + max, no mask vreg.
            h = jnp.maximum(h, LEAKY_SLOPE * h)
            # BatchNorm1d (training-mode batch stats, biased variance), folded:
            # single pass over h for the moments, then one fused scale/shift pass.
            s1 = jnp.sum(h, axis=0, keepdims=True)            # (1, C)
            s2 = jnp.sum(h * h, axis=0, keepdims=True)        # (1, C)
            mean = s1 * inv_n
            var = jnp.maximum(s2 * inv_n - mean * mean, 0.0)  # clamp FP cancellation
            scale = g_ref[...] * jax.lax.rsqrt(var + BN_EPS)  # (1, C)
            shift = bt_ref[...] - mean * scale                # (1, C)
            h = h * scale + shift

        # global_max_pool: masked segment max over the node (sublane) axis per graph.
        # G is small & static -> unrolled; rows gathered and stored with ONE full store.
        bid = bid_ref[...]                                    # (N, 1) int32
        neg = jnp.float32(jnp.finfo(jnp.float32).min)         # empty graphs -> finfo.min
        rows = []
        for g in range(num_graphs):
            mask = bid == g                                   # (N, 1) -> lane-broadcast
            rows.append(jnp.max(jnp.where(mask, h, neg), axis=0, keepdims=True))
        if g_pad > num_graphs:
            rows.append(jnp.zeros((g_pad - num_graphs, h.shape[1]), jnp.float32))
        out_ref[...] = jnp.concatenate(rows, axis=0)          # single unmasked store

    return kernel


def _estimate_vmem_bytes(n, c0p, layer_dims_p, g_pad, w_itemsize):
    cmax = max([c0p] + [co for _, co in layer_dims_p])
    act = 3 * 4 * n * cmax                                   # ~3 live (N, Cmax) f32 bufs
    io = 4 * n * c0p + 4 * n + 4 * g_pad * layer_dims_p[-1][1]
    wts = sum(w_itemsize * ci * co + 3 * 4 * co for ci, co in layer_dims_p)
    return act + io + wts


def global_base_module_forward(x, pos, batch, params, num_graphs,
                               matmul_dtype=jnp.float32):
    """Pallas implementation of GlobalBaseModule.forward.

    x: (N, F) float32, pos: (N, 3) float32, batch: (N,) int32 in [0, num_graphs)
    params: list of (W, b, gamma, beta) per MLP layer (W is (C_in, C_out)).
    Returns dict with keys x (G, C_out), pos (G, 3) zeros, batch (G,) arange.
    """
    xin = jnp.concatenate([x, pos], axis=1).astype(jnp.float32)       # (N, C0)
    n, c0 = xin.shape
    c0p = _round_up(c0, LANE)
    xin_p = jnp.pad(xin, ((0, 0), (0, c0p - c0)))                     # lane-dense input
    bid = batch.astype(jnp.int32).reshape(n, 1)                       # (N, 1) int32

    # Zero-pad every channel dim up to a multiple of 128 lanes. Padded channels stay
    # exactly zero through Linear (zero W cols, zero bias), LeakyReLU(0)=0 and BN
    # (mean=var=0, gamma_pad=beta_pad=0 -> scale*0+shift = 0), so no correction needed.
    flat_params = []
    layer_dims_p = []
    c_prev_p = c0p
    for (w, b, g, bt) in params:
        cin, cout = w.shape
        cout_p = _round_up(cout, LANE)
        w_p = (jnp.zeros((c_prev_p, cout_p), jnp.float32)
               .at[:cin, :cout].set(w.astype(jnp.float32))).astype(matmul_dtype)
        b_p = jnp.zeros((1, cout_p), jnp.float32).at[:, :cout].set(
            b.reshape(1, -1).astype(jnp.float32))
        g_p = jnp.zeros((1, cout_p), jnp.float32).at[:, :cout].set(
            g.reshape(1, -1).astype(jnp.float32))
        bt_p = jnp.zeros((1, cout_p), jnp.float32).at[:, :cout].set(
            bt.reshape(1, -1).astype(jnp.float32))
        flat_params += [w_p, b_p, g_p, bt_p]
        layer_dims_p.append((c_prev_p, cout_p))
        c_prev_p = cout_p

    c_out = params[-1][0].shape[1]
    c_out_p = c_prev_p
    g_pad = _round_up(max(num_graphs, 1), SUBLANE)
    num_layers = len(params)
    kernel = _make_kernel(num_layers, num_graphs, g_pad, n)

    # Explicit VMEM budgeting: only raise the scoped limit if this fused single block
    # actually needs more than the ~24 MiB comfortably inside every generation's default.
    w_itemsize = jnp.dtype(matmul_dtype).itemsize
    vmem_need = _estimate_vmem_bytes(n, c0p, layer_dims_p, g_pad, w_itemsize)
    compiler_params = None
    if vmem_need > (24 << 20):
        compiler_params = pltpu.CompilerParams(
            vmem_limit_bytes=int(min(vmem_need * 5 // 4, 64 << 20)))

    num_inputs = 2 + 4 * num_layers
    pooled_p = pl.pallas_call(
        kernel,
        out_shape=jax.ShapeDtypeStruct((g_pad, c_out_p), jnp.float32),
        in_specs=[pl.BlockSpec(memory_space=pltpu.MemorySpace.VMEM)] * num_inputs,
        out_specs=pl.BlockSpec(memory_space=pltpu.MemorySpace.VMEM),
        compiler_params=compiler_params,
    )(bid, xin_p, *flat_params)

    pooled = pooled_p[:num_graphs, :c_out]

    out_pos = jnp.zeros((num_graphs, 3), dtype=pos.dtype)
    out_batch = jnp.arange(num_graphs, dtype=jnp.int32)
    return {"x": pooled, "pos": out_pos, "batch": out_batch}


def _reference_forward(x, pos, batch, params, num_graphs):
    """Pure-JAX reference (mirrors the torch forward) for correctness checking."""
    h = jnp.concatenate([x, pos], axis=1).astype(jnp.float32)
    for (w, b, g, bt) in params:
        h = h @ w + b.reshape(1, -1)
        h = jnp.where(h > 0, h, LEAKY_SLOPE * h)
        mean = jnp.mean(h, axis=0, keepdims=True)
        var = jnp.mean(jnp.square(h - mean), axis=0, keepdims=True)
        h = (h - mean) * jax.lax.rsqrt(var + BN_EPS) * g.reshape(1, -1) + bt.reshape(1, -1)
    neg = jnp.float32(jnp.finfo(jnp.float32).min)
    oh = (batch[:, None] == jnp.arange(num_graphs)[None, :])
    pooled = jnp.max(jnp.where(oh[:, :, None], h[:, None, :], neg), axis=0)
    return pooled


if __name__ == "__main__":
    key = jax.random.PRNGKey(0)

    # Small synthetic problem: N nodes across G graphs, feature dim F, MLP [F+3, 32, 32].
    N, F, G = 16, 4, 2
    channels = [F + 3, 32, 32]

    k_x, k_pos, *k_w = jax.random.split(key, 2 + 2 * (len(channels) - 1))
    x = jax.random.normal(k_x, (N, F), dtype=jnp.float32)
    pos = jax.random.normal(k_pos, (N, 3), dtype=jnp.float32)
    batch = jnp.repeat(jnp.arange(G, dtype=jnp.int32), N // G)  # sorted segment ids

    # Deterministic parameter init (Linear weight/bias, BatchNorm gamma=1 / beta=0).
    params = []
    for i in range(1, len(channels)):
        cin, cout = channels[i - 1], channels[i]
        kw, kb = k_w[2 * (i - 1)], k_w[2 * (i - 1) + 1]
        bound = 1.0 / (cin ** 0.5)
        w = jax.random.uniform(kw, (cin, cout), minval=-bound, maxval=bound, dtype=jnp.float32)
        b = jax.random.uniform(kb, (cout,), minval=-bound, maxval=bound, dtype=jnp.float32)
        gamma = jnp.ones((cout,), dtype=jnp.float32)
        beta = jnp.zeros((cout,), dtype=jnp.float32)
        params.append((w, b, gamma, beta))

    out = global_base_module_forward(x, pos, batch, params, num_graphs=G)
    jax.block_until_ready(out["x"])

    ref = _reference_forward(x, pos, batch, params, num_graphs=G)
    assert out["x"].shape == (G, channels[-1])
    assert out["pos"].shape == (G, 3)
    assert out["batch"].shape == (G,)
    assert jnp.allclose(out["x"], ref, atol=1e-4, rtol=1e-4), "mismatch vs reference"

    print("KERNEL_OK")
</pallas_src>

<mosaic_0001>
module attributes {stable_mosaic.version = 11 : i64} {
  func.func @kernel(%arg0: memref<16x1xi32, #tpu.memory_space<vmem>>, %arg1: memref<16x128xf32, #tpu.memory_space<vmem>>, %arg2: memref<128x128xf32, #tpu.memory_space<vmem>>, %arg3: memref<1x128xf32, #tpu.memory_space<vmem>>, %arg4: memref<1x128xf32, #tpu.memory_space<vmem>>, %arg5: memref<1x128xf32, #tpu.memory_space<vmem>>, %arg6: memref<128x128xf32, #tpu.memory_space<vmem>>, %arg7: memref<1x128xf32, #tpu.memory_space<vmem>>, %arg8: memref<1x128xf32, #tpu.memory_space<vmem>>, %arg9: memref<1x128xf32, #tpu.memory_space<vmem>>, %arg10: memref<8x128xf32, #tpu.memory_space<vmem>>) attributes {dimension_semantics = [], scalar_prefetch = 0 : i64, scratch_operands = 0 : i64, tpu.core_type = #tpu.core_type<tc>} {
    %c0 = arith.constant 0 : index
    %c0_0 = arith.constant 0 : index
    %0 = vector.load %arg1[%c0, %c0_0] : memref<16x128xf32, #tpu.memory_space<vmem>>, vector<16x128xf32>
    %c0_1 = arith.constant 0 : index
    %c0_2 = arith.constant 0 : index
    %1 = vector.load %arg2[%c0_1, %c0_2] : memref<128x128xf32, #tpu.memory_space<vmem>>, vector<128x128xf32>
    %cst = arith.constant dense<0.000000e+00> : vector<16x128xf32>
    %2 = tpu.matmul %0, %1, %cst {dimension_numbers = #tpu.dot_dimension_numbers<[1], [0], [0], [1], [0, 0, 1, 1], [], []>} : vector<16x128xf32>, vector<128x128xf32>, vector<16x128xf32> -> vector<16x128xf32>
    %c0_3 = arith.constant 0 : index
    %c0_4 = arith.constant 0 : index
    %3 = vector.load %arg3[%c0_3, %c0_4] : memref<1x128xf32, #tpu.memory_space<vmem>>, vector<1x128xf32>
    %4 = vector.broadcast %3 : vector<1x128xf32> to vector<16x128xf32>
    %5 = arith.addf %2, %4 : vector<16x128xf32>
    %cst_5 = arith.constant 2.000000e-01 : f32
    %6 = vector.broadcast %cst_5 : f32 to vector<16x128xf32>
    %7 = arith.mulf %6, %5 : vector<16x128xf32>
    %8 = arith.maximumf %5, %7 : vector<16x128xf32>
    %cst_6 = arith.constant dense<0.000000e+00> : vector<128xf32>
    %9 = vector.multi_reduction <add>, %8, %cst_6 [0] : vector<16x128xf32> to vector<128xf32>
    %10 = vector.shape_cast %9 : vector<128xf32> to vector<1x128xf32>
    %11 = arith.mulf %8, %8 : vector<16x128xf32>
    %cst_7 = arith.constant dense<0.000000e+00> : vector<128xf32>
    %12 = vector.multi_reduction <add>, %11, %cst_7 [0] : vector<16x128xf32> to vector<128xf32>
    %13 = vector.shape_cast %12 : vector<128xf32> to vector<1x128xf32>
    %cst_8 = arith.constant 6.250000e-02 : f32
    %14 = vector.broadcast %cst_8 : f32 to vector<1x128xf32>
    %15 = arith.mulf %10, %14 : vector<1x128xf32>
    %cst_9 = arith.constant 6.250000e-02 : f32
    %16 = vector.broadcast %cst_9 : f32 to vector<1x128xf32>
    %17 = arith.mulf %13, %16 : vector<1x128xf32>
    %18 = arith.mulf %15, %15 : vector<1x128xf32>
    %19 = arith.subf %17, %18 : vector<1x128xf32>
    %cst_10 = arith.constant 0.000000e+00 : f32
    %20 = vector.broadcast %cst_10 : f32 to vector<1x128xf32>
    %21 = arith.maximumf %19, %20 : vector<1x128xf32>
    %c0_11 = arith.constant 0 : index
    %c0_12 = arith.constant 0 : index
    %22 = vector.load %arg4[%c0_11, %c0_12] : memref<1x128xf32, #tpu.memory_space<vmem>>, vector<1x128xf32>
    %cst_13 = arith.constant 9.99999974E-6 : f32
    %23 = vector.broadcast %cst_13 : f32 to vector<1x128xf32>
    %24 = arith.addf %21, %23 : vector<1x128xf32>
    %25 = math.rsqrt %24 : vector<1x128xf32>
    %26 = arith.mulf %22, %25 : vector<1x128xf32>
    %c0_14 = arith.constant 0 : index
    %c0_15 = arith.constant 0 : index
    %27 = vector.load %arg5[%c0_14, %c0_15] : memref<1x128xf32, #tpu.memory_space<vmem>>, vector<1x128xf32>
    %28 = arith.mulf %15, %26 : vector<1x128xf32>
    %29 = arith.subf %27, %28 : vector<1x128xf32>
    %30 = vector.broadcast %26 : vector<1x128xf32> to vector<16x128xf32>
    %31 = arith.mulf %8, %30 : vector<16x128xf32>
    %32 = vector.broadcast %29 : vector<1x128xf32> to vector<16x128xf32>
    %33 = arith.addf %31, %32 : vector<16x128xf32>
    %c0_16 = arith.constant 0 : index
    %c0_17 = arith.constant 0 : index
    %34 = vector.load %arg6[%c0_16, %c0_17] : memref<128x128xf32, #tpu.memory_space<vmem>>, vector<128x128xf32>
    %cst_18 = arith.constant dense<0.000000e+00> : vector<16x128xf32>
    %35 = tpu.matmul %33, %34, %cst_18 {dimension_numbers = #tpu.dot_dimension_numbers<[1], [0], [0], [1], [0, 0, 1, 1], [], []>} : vector<16x128xf32>, vector<128x128xf32>, vector<16x128xf32> -> vector<16x128xf32>
    %c0_19 = arith.constant 0 : index
    %c0_20 = arith.constant 0 : index
    %36 = vector.load %arg7[%c0_19, %c0_20] : memref<1x128xf32, #tpu.memory_space<vmem>>, vector<1x128xf32>
    %37 = vector.broadcast %36 : vector<1x128xf32> to vector<16x128xf32>
    %38 = arith.addf %35, %37 : vector<16x128xf32>
    %cst_21 = arith.constant 2.000000e-01 : f32
    %39 = vector.broadcast %cst_21 : f32 to vector<16x128xf32>
    %40 = arith.mulf %39, %38 : vector<16x128xf32>
    %41 = arith.maximumf %38, %40 : vector<16x128xf32>
    %cst_22 = arith.constant dense<0.000000e+00> : vector<128xf32>
    %42 = vector.multi_reduction <add>, %41, %cst_22 [0] : vector<16x128xf32> to vector<128xf32>
    %43 = vector.shape_cast %42 : vector<128xf32> to vector<1x128xf32>
    %44 = arith.mulf %41, %41 : vector<16x128xf32>
    %cst_23 = arith.constant dense<0.000000e+00> : vector<128xf32>
    %45 = vector.multi_reduction <add>, %44, %cst_23 [0] : vector<16x128xf32> to vector<128xf32>
    %46 = vector.shape_cast %45 : vector<128xf32> to vector<1x128xf32>
    %cst_24 = arith.constant 6.250000e-02 : f32
    %47 = vector.broadcast %cst_24 : f32 to vector<1x128xf32>
    %48 = arith.mulf %43, %47 : vector<1x128xf32>
    %cst_25 = arith.constant 6.250000e-02 : f32
    %49 = vector.broadcast %cst_25 : f32 to vector<1x128xf32>
    %50 = arith.mulf %46, %49 : vector<1x128xf32>
    %51 = arith.mulf %48, %48 : vector<1x128xf32>
    %52 = arith.subf %50, %51 : vector<1x128xf32>
    %cst_26 = arith.constant 0.000000e+00 : f32
    %53 = vector.broadcast %cst_26 : f32 to vector<1x128xf32>
    %54 = arith.maximumf %52, %53 : vector<1x128xf32>
    %c0_27 = arith.constant 0 : index
    %c0_28 = arith.constant 0 : index
    %55 = vector.load %arg8[%c0_27, %c0_28] : memref<1x128xf32, #tpu.memory_space<vmem>>, vector<1x128xf32>
    %cst_29 = arith.constant 9.99999974E-6 : f32
    %56 = vector.broadcast %cst_29 : f32 to vector<1x128xf32>
    %57 = arith.addf %54, %56 : vector<1x128xf32>
    %58 = math.rsqrt %57 : vector<1x128xf32>
    %59 = arith.mulf %55, %58 : vector<1x128xf32>
    %c0_30 = arith.constant 0 : index
    %c0_31 = arith.constant 0 : index
    %60 = vector.load %arg9[%c0_30, %c0_31] : memref<1x128xf32, #tpu.memory_space<vmem>>, vector<1x128xf32>
    %61 = arith.mulf %48, %59 : vector<1x128xf32>
    %62 = arith.subf %60, %61 : vector<1x128xf32>
    %63 = vector.broadcast %59 : vector<1x128xf32> to vector<16x128xf32>
    %64 = arith.mulf %41, %63 : vector<16x128xf32>
    %65 = vector.broadcast %62 : vector<1x128xf32> to vector<16x128xf32>
    %66 = arith.addf %64, %65 : vector<16x128xf32>
    %c0_32 = arith.constant 0 : index
    %c0_33 = arith.constant 0 : index
    %67 = vector.load %arg0[%c0_32, %c0_33] : memref<16x1xi32, #tpu.memory_space<vmem>>, vector<16x1xi32>
    %c0_i32 = arith.constant 0 : i32
    %68 = vector.broadcast %c0_i32 : i32 to vector<16x1xi32>
    %69 = arith.cmpi eq, %67, %68 : vector<16x1xi32>
    %cst_34 = arith.constant -3.40282347E+38 : f32
    %70 = vector.shape_cast %69 : vector<16x1xi1> to vector<16x1xi1>
    %71 = vector.broadcast %70 : vector<16x1xi1> to vector<16x128xi1>
    %72 = vector.broadcast %cst_34 : f32 to vector<16x128xf32>
    %73 = arith.select %71, %66, %72 : vector<16x128xi1>, vector<16x128xf32>
    %cst_35 = arith.constant dense<0xFF800000> : vector<128xf32>
    %74 = vector.multi_reduction <maximumf>, %73, %cst_35 [0] : vector<16x128xf32> to vector<128xf32>
    %75 = vector.shape_cast %74 : vector<128xf32> to vector<1x128xf32>
    %c1_i32 = arith.constant 1 : i32
    %76 = vector.broadcast %c1_i32 : i32 to vector<16x1xi32>
    %77 = arith.cmpi eq, %67, %76 : vector<16x1xi32>
    %cst_36 = arith.constant -3.40282347E+38 : f32
    %78 = vector.shape_cast %77 : vector<16x1xi1> to vector<16x1xi1>
    %79 = vector.broadcast %78 : vector<16x1xi1> to vector<16x128xi1>
    %80 = vector.broadcast %cst_36 : f32 to vector<16x128xf32>
    %81 = arith.select %79, %66, %80 : vector<16x128xi1>, vector<16x128xf32>
    %cst_37 = arith.constant dense<0xFF800000> : vector<128xf32>
    %82 = vector.multi_reduction <maximumf>, %81, %cst_37 [0] : vector<16x128xf32> to vector<128xf32>
    %83 = vector.shape_cast %82 : vector<128xf32> to vector<1x128xf32>
    %cst_38 = arith.constant 0.000000e+00 : f32
    %84 = vector.broadcast %cst_38 : f32 to vector<6x128xf32>
    %85 = tpu.concatenate %75, %83, %84 in 0 : vector<1x128xf32>, vector<1x128xf32>, vector<6x128xf32> -> vector<8x128xf32>
    %c0_39 = arith.constant 0 : index
    %c0_40 = arith.constant 0 : index
    %86 = vector.load %arg10[%c0_39, %c0_40] : memref<8x128xf32, #tpu.memory_space<vmem>>, vector<8x128xf32>
    tpu.vector_store %arg10[%c0_39, %c0_40], %85 {strides = array<i32>} : memref<8x128xf32, #tpu.memory_space<vmem>>, vector<8x128xf32>,
    return
  }
}

</mosaic_0001>

<bundles_post_ra>
// kernel: tpu_custom_call.1
= control target key start
LH: loop header
LB: loop body
LE: loop exit
PB: predicated region body
PF: predicated region fallthrough
CT: control target
= control target key end

     0   :  { %15 = vsyncpa [#allocation3], 0  ;;  %s806_s0 = inlined_call_operand.vmem [shape: s32[16,1], index: 0, kind: input, shape index: {}]   ;;  %s807_s1 = inlined_call_operand.vmem [shape: f32[16,128], index: 1, kind: input, shape index: {}]   ;;  %s808_s2 = inlined_call_operand.hbm [shape: f32[128,128], index: 2, kind: input, shape index: {}]   ;;  %s809_s3 = inlined_call_operand.vmem [shape: f32[1,128], index: 3, kind: input, shape index: {}]   ;;  %s810_s4 = inlined_call_operand.vmem [shape: f32[1,128], index: 4, kind: input, shape index: {}]   ;;  %s811_s5 = inlined_call_operand.vmem [shape: f32[1,128], index: 5, kind: input, shape index: {}]   ;;  %s812_s6 = inlined_call_operand.hbm [shape: f32[128,128], index: 6, kind: input, shape index: {}]   ;;  %s813_s7 = inlined_call_operand.vmem [shape: f32[1,128], index: 7, kind: input, shape index: {}]   ;;  %s814_s8 = inlined_call_operand.vmem [shape: f32[1,128], index: 8, kind: input, shape index: {}]   ;;  %s815_s9 = inlined_call_operand.vmem [shape: f32[1,128], index: 9, kind: input, shape index: {}]   ;;  %s816_s10 = inlined_call_operand.hbm [shape: f32[8,128], index: 10, kind: output, shape index: {}]  }
   0x1   :  { %16 = vsyncpa [#allocation6], 0 }
   0x2   :  { %17 = vsyncpa [#allocation4], 0  ;;  %s679_s13 = smov [#allocation2]   ;;  %s607_s17 = scalar_lea.hbm %s808_s2, 2048 }
   0x3   :  { %s27_s14 = sshll.u32 %s679_s13, 4  ;;  %p608_p0 = scmp.ne.s32.totalorder %s808_s2, %s607_s17  ;;  %s28_s14 = int_to_ptr.vmem [resolvable:$true] %s27_s14 }
   0x4   :  { %p611_p1 = scmp.lt.u32.totalorder %s607_s17, %s808_s2 }
   0x6   :  { %p613_p2 = pnand %p611_p1, %p608_p0 }
   0x8   :  { %616 = shalt.err (!%p613_p2)
}
   0x9   :  { %s617_s22 = scalar_lea.vmem %s28_s14, 2048  ;;  %p622_p4 = scmp.lt.s32.totalorder %s28_s14, %s28_s14 }
   0xa   :  { %p618_p3 = scmp.ne.s32.totalorder %s28_s14, %s617_s22  ;;  %p623_p5 = scmp.lt.s32.totalorder %s617_s22, %s617_s22 }
   0xc   :  { %p624_p6 = por %p623_p5, %p622_p4 }
   0xe   :  { %p625_p7 = pnand %p624_p6, %p618_p3 }
  0x10   :  { %628 = shalt.err (!%p625_p7)
}
  0x11   :  { %s680_s23 = smov 128   ;;  %s681_s24 = smov 8  }
  0x12   :  { %33 = dma.hbm_to_vmem [thread:$0]  %s808_s2, 2048, %s28_s14, [#allocation3], %s680_s23, %s680_s23, %s681_s24  }
  0x13   :  { %s682_s27 = smov [#allocation5]   ;;  %s629_s11 = scalar_lea.hbm %s812_s6, 2048 }
  0x14   :  { %s45_s28 = sshll.u32 %s682_s27, 4  ;;  %p630_p8 = scmp.ne.s32.totalorder %s812_s6, %s629_s11  ;;  %s46_s28 = int_to_ptr.vmem [resolvable:$true] %s45_s28 }
  0x15   :  { %p633_p9 = scmp.lt.u32.totalorder %s629_s11, %s812_s6 }
  0x17   :  { %p635_p10 = pnand %p633_p9, %p630_p8 }
  0x19   :  { %638 = shalt.err (!%p635_p10)
}
  0x1a   :  { %s639_s17 = scalar_lea.vmem %s46_s28, 2048  ;;  %p644_p12 = scmp.lt.s32.totalorder %s46_s28, %s46_s28 }
  0x1b   :  { %p640_p11 = scmp.ne.s32.totalorder %s46_s28, %s639_s17  ;;  %p645_p13 = scmp.lt.s32.totalorder %s639_s17, %s639_s17 }
  0x1d   :  { %p646_p0 = por %p645_p13, %p644_p12 }
  0x1f   :  { %p647_p1 = pnand %p646_p0, %p640_p11 }
  0x21   :  { %650 = shalt.err (!%p647_p1)
}
  0x22   :  { %51 = dma.hbm_to_vmem [thread:$0]  %s812_s6, 2048, %s46_s28, [#allocation6], %s680_s23, %s680_s23, %s681_s24  }
  0x23   :  { %673 = dma.done.wait [#allocation3], 2048  }
  0x24   :  { %674 = vsyncadd [#allocation3], 4294965248 }
  0x25   :  { %675 = dma.done.wait [#allocation6], 2048  }
  0x26   :  { %676 = vsyncadd [#allocation6], 4294965248  ;;  %v66_v0 = vld [vmem:[#allocation2] sm:$0xff]  ;;  %v67_v1 = vld [vmem:[#allocation2 + $0x8] sm:$0xff]  ;;  %v683_v52 = vmov 0   ;;  %vm402_vm8 = vcmask 1040384  }
  0x27   :  { %v68_v2 = vld [vmem:[#allocation2 + $0x10] sm:$0xff]  ;;  %v531_v3 = vpack.c.bf16 %v67_v1, %v66_v0  ;;  %v69_v4 = vld [vmem:[#allocation2 + $0x18] sm:$0xff]  ;;  %v70_v6 = vld [vmem:[#allocation2 + $0x20] sm:$0xff]  ;;  %602 = vset.pattern.permute.xlu1 %v683_v52  ;;  %601 = vset.pattern.permute.xlu0 %v683_v52  ;;  %vm404_vm9 = vcmask 1041408  }
  0x28   :  { %v535_v5 = vpack.c.bf16 %v69_v4, %v68_v2  ;;  %v71_v7 = vld [vmem:[#allocation2 + $0x28] sm:$0xff]  ;;  %v64_v9 = vld [vmem:[%s807_s1] sm:$0xff]  ;;  %v73_v11 = vld [vmem:[#allocation2 + $0x38] sm:$0xff] }
  0x29   :  { %532 = vmatprep.subr.bf16.mxu0 %v531_v3  ;;  %v539_v8 = vpack.c.bf16 %v71_v7, %v70_v6  ;;  %v72_v10 = vld [vmem:[#allocation2 + $0x30] sm:$0xff]  ;;  %493 = vmatprep.mubr.f32.mxu0 %v64_v9  ;;  %v74_v13 = vld [vmem:[#allocation2 + $0x40] sm:$0xff]  ;;  %v75_v14 = vld [vmem:[#allocation2 + $0x48] sm:$0xff] }
  0x2a   :  { %534 = vmatpush3.bf16.msra.mxu0 %v531_v3  ;;  %v543_v12 = vpack.c.bf16 %v73_v11, %v72_v10  ;;  %v547_v15 = vpack.c.bf16 %v75_v14, %v74_v13  ;;  %v76_v16 = vld [vmem:[#allocation2 + $0x50] sm:$0xff]  ;;  %v77_v17 = vld [vmem:[#allocation2 + $0x58] sm:$0xff]  ;;  %v78_v19 = vld [vmem:[#allocation2 + $0x60] sm:$0xff] }
  0x2b   :  { %536 = vmatprep.subr.bf16.mxu0 %v535_v5  ;;  %v551_v18 = vpack.c.bf16 %v77_v17, %v76_v16  ;;  %v79_v20 = vld [vmem:[#allocation2 + $0x68] sm:$0xff]  ;;  %v80_v22 = vld [vmem:[#allocation2 + $0x70] sm:$0xff]  ;;  %v81_v23 = vld [vmem:[#allocation2 + $0x78] sm:$0xff] }
  0x2c   :  { %v555_v21 = vpack.c.bf16 %v79_v20, %v78_v19  ;;  %v559_v24 = vpack.c.bf16 %v81_v23, %v80_v22  ;;  %v65_v25 = vld [vmem:[%s807_s1 + $0x8] sm:$0xff]  ;;  %v212_v26 = vld [vmem:[#allocation5] sm:$0xff]  ;;  %v213_v27 = vld [vmem:[#allocation5 + $0x8] sm:$0xff] }
  0x2d   :  { %v563_v28 = vpack.c.bf16 %v213_v27, %v212_v26  ;;  %v214_v29 = vld [vmem:[#allocation5 + $0x10] sm:$0xff]  ;;  %v215_v30 = vld [vmem:[#allocation5 + $0x18] sm:$0xff]  ;;  %v216_v32 = vld [vmem:[#allocation5 + $0x20] sm:$0xff] }
  0x2e   :  { %538 = vmatpush3.bf16.msra.mxu0 %v535_v5  ;;  %v567_v31 = vpack.c.bf16 %v215_v30, %v214_v29  ;;  %v217_v33 = vld [vmem:[#allocation5 + $0x28] sm:$0xff]  ;;  %v218_v35 = vld [vmem:[#allocation5 + $0x30] sm:$0xff]  ;;  %v219_v36 = vld [vmem:[#allocation5 + $0x38] sm:$0xff] }
  0x2f   :  { %540 = vmatprep.subr.bf16.mxu0 %v539_v8  ;;  %564 = vmatprep.subr.bf16.mxu1 %v563_v28  ;;  %v571_v34 = vpack.c.bf16 %v217_v33, %v216_v32  ;;  %v575_v37 = vpack.c.bf16 %v219_v36, %v218_v35  ;;  %v220_v38 = vld [vmem:[#allocation5 + $0x40] sm:$0xff]  ;;  %v221_v39 = vld [vmem:[#allocation5 + $0x48] sm:$0xff]  ;;  %v222_v41 = vld [vmem:[#allocation5 + $0x50] sm:$0xff] }
  0x30   :  { %566 = vmatpush3.bf16.msra.mxu1 %v563_v28  ;;  %v579_v40 = vpack.c.bf16 %v221_v39, %v220_v38  ;;  %v223_v42 = vld [vmem:[#allocation5 + $0x58] sm:$0xff]  ;;  %v224_v44 = vld [vmem:[#allocation5 + $0x60] sm:$0xff]  ;;  %v225_v45 = vld [vmem:[#allocation5 + $0x68] sm:$0xff] }
  0x31   :  { %568 = vmatprep.subr.bf16.mxu1 %v567_v31  ;;  %v583_v43 = vpack.c.bf16 %v223_v42, %v222_v41  ;;  %v587_v46 = vpack.c.bf16 %v225_v45, %v224_v44  ;;  %v226_v47 = vld [vmem:[#allocation5 + $0x70] sm:$0xff]  ;;  %v227_v48 = vld [vmem:[#allocation5 + $0x78] sm:$0xff] }
  0x32   :  { %542 = vmatpush3.bf16.msra.mxu0 %v539_v8  ;;  %v591_v49 = vpack.c.bf16 %v227_v48, %v226_v47  ;;  %v358_v50 = vld [vmem:[%s806_s0] sm:$0xff]  ;;  %v359_v51 = vld [vmem:[%s806_s0 + $0x8] sm:$0xff] }
  0x33   :  { %544 = vmatprep.subr.bf16.mxu0 %v543_v12  ;;  %vm381_vm0 = vcmp.eq.s32.totalorder %v358_v50, 1  ;;  %vm360_vm1 = vcmp.eq.s32.totalorder %v358_v50, 0  ;;  %vm382_vm2 = vcmp.eq.s32.totalorder %v359_v51, 1  ;;  %vm361_vm3 = vcmp.eq.s32.totalorder %v359_v51, 0  ;;  %v423_v57 = vld [vmem:[%s809_s3] ss:$0 sm:$0xff] }
  0x34   :  { %570 = vmatpush3.bf16.msra.mxu1 %v567_v31  ;;  %v383_v53 = vsel %vm381_vm0, 1, %v683_v52  ;;  %v362_v54 = vsel %vm360_vm1, 1, %v683_v52  ;;  %v384_v55 = vsel %vm382_vm2, 1, %v683_v52  ;;  %v363_v56 = vsel %vm361_vm3, 1, %v683_v52  ;;  %v189_v26 = vld [vmem:[%s810_s4] sm:$0x1] }
  0x35   :  { %572 = vmatprep.subr.bf16.mxu1 %v571_v34  ;;  %386 = vperm.xlu1 %602, %v383_v53   ;;  %v193_v30 = vld [vmem:[%s811_s5] sm:$0x1] }
  0x36   :  { %546 = vmatpush3.bf16.msra.mxu0 %v543_v12  ;;  %365 = vperm.xlu0 %601, %v362_v54   ;;  %v424_v39 = vld [vmem:[%s813_s7] ss:$0 sm:$0xff] }
  0x37   :  { %548 = vmatprep.subr.bf16.mxu0 %v547_v15 }
  0x38   :  { %574 = vmatpush3.bf16.msra.mxu1 %v571_v34 }
  0x39   :  { %576 = vmatprep.subr.bf16.mxu1 %v575_v37  ;;  %389 = vperm.xlu1 %602, %v384_v55  }
  0x3a   :  { %550 = vmatpush3.bf16.msra.mxu0 %v547_v15  ;;  %368 = vperm.xlu0 %601, %v363_v56  }
  0x3b   :  { %552 = vmatprep.subr.bf16.mxu0 %v551_v18 }
  0x3c   :  { %578 = vmatpush3.bf16.msra.mxu1 %v575_v37 }
  0x3d   :  { %580 = vmatprep.subr.bf16.mxu1 %v579_v40 }
  0x3e   :  { %554 = vmatpush3.bf16.msra.mxu0 %v551_v18 }
  0x3f   :  { %556 = vmatprep.subr.bf16.mxu0 %v555_v21 }
  0x40   :  { %582 = vmatpush3.bf16.msra.mxu1 %v579_v40 }
  0x41   :  { %584 = vmatprep.subr.bf16.mxu1 %v583_v43 }
  0x42   :  { %558 = vmatpush3.bf16.msra.mxu0 %v555_v21 }
  0x43   :  { %560 = vmatprep.subr.bf16.mxu0 %v559_v24 }
  0x44   :  { %586 = vmatpush3.bf16.msra.mxu1 %v583_v43 }
  0x45   :  { %588 = vmatprep.subr.bf16.mxu1 %v587_v46 }
  0x46   :  { %562 = vmatpush3.bf16.msra.mxu0 %v559_v24  ;;  %v197_v24 = vlaneseq }
  0x48   :  { %590 = vmatpush3.bf16.msra.mxu1 %v587_v46 }
  0x49   :  { %494 = vmatmul.mubr.f32.vlgmr.msra.gmra.mrb[0].mxu0 %v65_v25  ;;  %592 = vmatprep.subr.bf16.mxu1 %v591_v49  ;;  %v198_v25 = vshrl.u32 %v197_v24, 7 }
  0x4b   :  { %v199_v27 = vsub.s32 0, %v198_v25 }
  0x4c   :  { %594 = vmatpush3.bf16.msra.mxu1 %v591_v49 }
 0x11c   :  { %v495_v58 = vpop.f32.mrb[0].mxu0 }
 0x11d   :  { %v161_v59 = vadd.f32 %v495_v58, %v423_v57  ;;  %v155_v60 = vpop.f32.mrb[1].mxu0 }
 0x11e   :  { %v156_v61 = vadd.f32 %v423_v57, %v155_v60 }
 0x11f   :  { %v165_v62 = vmul.f32 0.2, %v161_v59 }
 0x120   :  { %v164_v63 = vmul.f32 0.2, %v156_v61 }
 0x121   :  { %v167_v0 = vmax.f32 %v161_v59, %v165_v62 }
 0x122   :  { %v166_v1 = vmax.f32 %v156_v61, %v164_v63 }
 0x123   :  { %v176_v2 = vmul.f32 %v167_v0, %v167_v0 }
 0x124   :  { %v168_v3 = vadd.f32 %v167_v0, %v166_v1  ;;  %v175_v4 = vmul.f32 %v166_v1, %v166_v1 }
 0x126   :  { %v169_v5 = vrot.slane %v168_v3, 4  ;;  %v177_v6 = vadd.f32 %v176_v2, %v175_v4 }
 0x128   :  { %v170_v7 = vadd.f32 %v169_v5, %v168_v3  ;;  %v178_v8 = vrot.slane %v177_v6, 4 }
 0x12a   :  { %v171_v9 = vrot.slane %v170_v7, 2  ;;  %v179_v10 = vadd.f32 %v178_v8, %v177_v6  ;;  %v335_v6 = vld [vmem:[%s814_s8] sm:$0x1]  ;;  %v387_v8 = vpop.permute.xlu1 %386  ;;  %s684_s8 = smov [#allocation7]  }
 0x12b   :  { %vm391_vm4 = vcmp.eq.s32.totalorder %v387_v8, 1 }
 0x12c   :  { %v180_v11 = vrot.slane %v179_v10, 2  ;;  %v172_v12 = vadd.f32 %v171_v9, %v170_v7 }
 0x12e   :  { %v181_v13 = vadd.f32 %v180_v11, %v179_v10  ;;  %v173_v14 = vrot.slane %v172_v12, 1  ;;  %v366_v10 = vpop.permute.xlu0 %365  ;;  %v339_v11 = vld [vmem:[%s815_s9] sm:$0x1]  ;;  %s413_s9 = sshll.u32 %s684_s8, 4  ;;  %s414_s9 = int_to_ptr.vmem [resolvable:$true] %s413_s9 }
 0x12f   :  { %vm370_vm5 = vcmp.eq.s32.totalorder %v366_v10, 1  ;;  %s651_s11 = scalar_lea.vmem %s414_s9, 128  ;;  %p656_p3 = scmp.lt.s32.totalorder %s414_s9, %s414_s9 }
 0x130   :  { %v182_v15 = vrot.slane %v181_v13, 1  ;;  %v174_v16 = vadd.f32 %v173_v14, %v172_v12  ;;  %p652_p2 = scmp.ne.s32.totalorder %s414_s9, %s651_s11  ;;  %p657_p4 = scmp.lt.s32.totalorder %s651_s11, %s651_s11 }
 0x132   :  { %v183_v17 = vadd.f32 %v182_v15, %v181_v13  ;;  %v184_v18 = vmul.f32 0.0625, %v174_v16  ;;  %p658_p5 = por %p657_p4, %p656_p3 }
 0x134   :  { %v185_v19 = vmul.f32 0.0625, %v183_v17  ;;  %v186_v20 = vmul.f32 %v184_v18, %v184_v18  ;;  %p659_p6 = pnand %p658_p5, %p652_p2 }
 0x136   :  { %v187_v21 = vsub.f32 %v185_v19, %v186_v20  ;;  %v369_v19 = vpop.permute.xlu0 %368 }
 0x137   :  { %vm371_vm7 = vcmp.eq.s32.totalorder %v369_v19, 1 }
 0x138   :  { %v188_v22 = vmax.f32 %v187_v21, 0.0 }
 0x13a   :  { %v190_v23 = vadd.f32 1e-05, %v188_v22 }
 0x13c   :  { %603 = vrsqrt.f32 %v190_v23 }
 0x146   :  { %v604_v28 = vpop.eup %603 }
 0x147   :  { %v192_v29 = vmul.f32 %v604_v28, %v189_v26 }
 0x149   :  { %v194_v31 = vmul.f32 %v192_v29, %v184_v18  ;;  %v200_v32 = vrot.slane %v192_v29, %v199_v27  ;;  %v390_v18 = vpop.permute.xlu1 %389 }
 0x14a   :  { %vm392_vm6 = vcmp.eq.s32.totalorder %v390_v18, 1 }
 0x14b   :  { %v195_v33 = vsub.f32 %v193_v30, %v194_v31  ;;  %v202_v34 = vmul.f32 %v200_v32, %v166_v1  ;;  %v203_v35 = vmul.f32 %v200_v32, %v167_v0 }
 0x14d   :  { %v208_v36 = vrot.slane %v195_v33, %v199_v27 }
 0x14f   :  { %v210_v37 = vadd.f32 %v208_v36, %v202_v34  ;;  %v211_v38 = vadd.f32 %v208_v36, %v203_v35 }
 0x151   :  { %528 = vmatprep.mubr.f32.mxu1 %v210_v37 }
 0x152   :  { %529 = vmatmul.mubr.f32.vlgmr.msra.gmra.mrb[0].mxu1 %v211_v38 }
 0x225   :  { %v530_v40 = vpop.f32.mrb[0].mxu1 }
 0x226   :  { %v307_v41 = vadd.f32 %v530_v40, %v424_v39  ;;  %v301_v42 = vpop.f32.mrb[1].mxu1 }
 0x227   :  { %v302_v43 = vadd.f32 %v424_v39, %v301_v42 }
 0x228   :  { %v311_v44 = vmul.f32 0.2, %v307_v41 }
 0x229   :  { %v310_v45 = vmul.f32 0.2, %v302_v43 }
 0x22a   :  { %v313_v46 = vmax.f32 %v307_v41, %v311_v44 }
 0x22b   :  { %v312_v47 = vmax.f32 %v302_v43, %v310_v45 }
 0x22c   :  { %v322_v48 = vmul.f32 %v313_v46, %v313_v46 }
 0x22d   :  { %v314_v49 = vadd.f32 %v313_v46, %v312_v47  ;;  %v321_v50 = vmul.f32 %v312_v47, %v312_v47 }
 0x22f   :  { %v315_v51 = vrot.slane %v314_v49, 4  ;;  %v323_v52 = vadd.f32 %v322_v48, %v321_v50 }
 0x231   :  { %v316_v53 = vadd.f32 %v315_v51, %v314_v49  ;;  %v324_v54 = vrot.slane %v323_v52, 4 }
 0x233   :  { %v317_v55 = vrot.slane %v316_v53, 2  ;;  %v325_v56 = vadd.f32 %v324_v54, %v323_v52 }
 0x235   :  { %v318_v57 = vadd.f32 %v317_v55, %v316_v53  ;;  %v326_v58 = vrot.slane %v325_v56, 2 }
 0x237   :  { %v319_v59 = vrot.slane %v318_v57, 1  ;;  %v327_v60 = vadd.f32 %v326_v58, %v325_v56 }
 0x239   :  { %v328_v61 = vrot.slane %v327_v60, 1  ;;  %v320_v62 = vadd.f32 %v319_v59, %v318_v57 }
 0x23b   :  { %v329_v63 = vadd.f32 %v328_v61, %v327_v60  ;;  %v330_v0 = vmul.f32 0.0625, %v320_v62 }
 0x23d   :  { %v331_v1 = vmul.f32 0.0625, %v329_v63  ;;  %v332_v2 = vmul.f32 %v330_v0, %v330_v0 }
 0x23f   :  { %v333_v3 = vsub.f32 %v331_v1, %v332_v2 }
 0x241   :  { %v334_v4 = vmax.f32 %v333_v3, 0.0 }
 0x243   :  { %v336_v5 = vadd.f32 1e-05, %v334_v4 }
 0x245   :  { %605 = vrsqrt.f32 %v336_v5 }
 0x24f   :  { %v606_v7 = vpop.eup %605 }
 0x250   :  { %v338_v9 = vmul.f32 %v606_v7, %v335_v6 }
 0x252   :  { %v340_v12 = vmul.f32 %v338_v9, %v330_v0  ;;  %v346_v13 = vrot.slane %v338_v9, %v199_v27 }
 0x254   :  { %v341_v14 = vsub.f32 %v339_v11, %v340_v12  ;;  %v348_v15 = vmul.f32 %v346_v13, %v312_v47  ;;  %v349_v16 = vmul.f32 %v346_v13, %v313_v46 }
 0x256   :  { %v354_v17 = vrot.slane %v341_v14, %v199_v27 }
 0x258   :  { %v356_v20 = vadd.f32 %v354_v17, %v348_v15  ;;  %v357_v21 = vadd.f32 %v354_v17, %v349_v16 }
 0x25a   :  { %v393_v22 = vsel %vm391_vm4, %v356_v20, -3.4028235e+38  ;;  %v372_v23 = vsel %vm370_vm5, %v356_v20, -3.4028235e+38  ;;  %v394_v24 = vsel %vm392_vm6, %v357_v21, -3.4028235e+38 }
 0x25b   :  { %v395_v25 = vmax.f32 %v393_v22, %v394_v24  ;;  %v373_v26 = vsel %vm371_vm7, %v357_v21, -3.4028235e+38 }
 0x25c   :  { %v374_v28 = vmax.f32 %v372_v23, %v373_v26 }
 0x25d   :  { %v396_v29 = vrot.slane %v395_v25, 4 }
 0x25e   :  { %v375_v30 = vrot.slane %v374_v28, 4 }
 0x25f   :  { %v397_v31 = vmax.f32 %v395_v25, %v396_v29 }
 0x260   :  { %v376_v32 = vmax.f32 %v374_v28, %v375_v30 }
 0x261   :  { %v398_v33 = vrot.slane %v397_v31, 2 }
 0x262   :  { %v377_v27 = vrot.slane %v376_v32, 2 }
 0x263   :  { %v399_v34 = vmax.f32 %v397_v31, %v398_v33 }
 0x264   :  { %v378_v35 = vmax.f32 %v376_v32, %v377_v27 }
 0x265   :  { %v400_v36 = vrot.slane %v399_v34, 1 }
 0x266   :  { %v379_v37 = vrot.slane %v378_v35, 1 }
 0x267   :  { %v401_v38 = vmax.f32 %v399_v34, %v400_v36 }
 0x268   :  { %v380_v39 = vmax.f32 %v378_v35, %v379_v37 }
 0x26a   :  { %v403_v40 = vsel %vm402_vm8, %v380_v39, %v401_v38 }
 0x26b   :  { %v405_v41 = vsel %vm404_vm9, %v403_v40, 0.0 }
 0x26c   :  { %406 = vst [vmem:[#allocation7] sm:$0xff] %v405_v41 }
 0x26d   :  { %662 = shalt.err (!%p659_p6)
}
 0x26e   :  { %s663_s15 = scalar_lea.hbm %s816_s10, 128 }
 0x26f   :  { %p664_p7 = scmp.ne.s32.totalorder %s816_s10, %s663_s15  ;;  %p667_p8 = scmp.lt.u32.totalorder %s663_s15, %s816_s10 }
 0x271   :  { %p669_p9 = pnand %p667_p8, %p664_p7 }
 0x273   :  { %672 = shalt.err (!%p669_p9)
}
 0x274   :  { %416 = dma.vmem_to_hbm [thread:$0]  %s414_s9, 128, %s816_s10, [#allocation4]  }
 0x275   :  { %677 = dma.done.wait [#allocation4], 128  }
 0x276   :  { %678 = vsyncadd [#allocation4], 4294967168 }
 0x277   :  { %420 = vsyncpa [#allocation3], 1 }
 0x278   :  { %421 = vsyncpa [#allocation6], 1 }
 0x279   :  { %422 = vsyncpa [#allocation4], 1 }

</bundles_post_ra>
